<compile_context>
chip_gen: v6e
topology: v6e:2x2x1
jax: 0.10.0
libtpu: 0.0.40
codegen_flags: <defaults>
</compile_context>

<pallas_src>
import jax
import jax.numpy as jnp
from jax.experimental import pallas as pl
from jax.experimental.pallas import tpu as pltpu


D_IN = 1152
D_HID = 64
D_OUT = 10
D_OUT_PAD = 128  # lane-dense output width


def _round_up(n, m):
    return ((n + m - 1) // m) * m


def _cdiv(a, b):
    return -(-a // b)


def servernet_kernel(x_ref, w1_ref, b1_ref, w2_ref, b2_ref, out_ref):
    # Cast the activation tile to bf16 on the VPU (no-op if already bf16);
    # keeps the HBM side of x at its native width (no wrapper astype pass).
    x_bf = x_ref[...].astype(jnp.bfloat16)
    # fc1: bf16 x bf16 on the MXU, f32 accumulation.
    h = jnp.dot(x_bf, w1_ref[...], preferred_element_type=jnp.float32)
    # bias + ReLU in f32 on the VPU (works on v5e, which lacks bf16 VALU).
    h = jnp.maximum(h + b1_ref[...], 0.0)
    # fc2: bf16 into the MXU again; bias add in f32, store in out dtype (bf16).
    o = jnp.dot(h.astype(jnp.bfloat16), w2_ref[...],
                preferred_element_type=jnp.float32)
    out_ref[...] = (o + b2_ref[...]).astype(out_ref.dtype)


def prepare_params(w1, b1, w2, b2):
    """One-time prep into kernel-ready layout (call once, reuse per forward)."""
    w1_bf = w1.astype(jnp.bfloat16)                                   # (1152, 64)
    w2_p = jnp.zeros((D_HID, D_OUT_PAD), jnp.bfloat16)
    w2_p = w2_p.at[:, :D_OUT].set(w2.astype(jnp.bfloat16))            # (64, 128)
    b1_2d = b1.reshape(1, D_HID).astype(jnp.float32)                  # (1, 64)
    b2_p = jnp.zeros((1, D_OUT_PAD), jnp.float32).at[:, :D_OUT].set(
        b2.astype(jnp.float32))                                       # (1, 128)
    return w1_bf, b1_2d, w2_p, b2_p


def _pick_batch_tile(B, block_b):
    """Balanced batch tiles: multiple of 16, even step count when >1 step."""
    block_b = max(16, _round_up(block_b, 16))
    n = _cdiv(B, block_b)
    if n > 1:
        n += n % 2                       # even step count -> both v7x TCs busy
    tb = _round_up(_cdiv(B, n), 16)      # balanced tiles cap tail padding
    grid_steps = _cdiv(B, tb)
    return tb, grid_steps


def servernet_forward(x, params, *, block_b=1024):
    """x: (B, 1152) f32 or bf16; params: output of prepare_params()."""
    w1_bf, b1_2d, w2_p, b2_p = params
    B, d_in = x.shape
    assert d_in == D_IN

    tb, grid_steps = _pick_batch_tile(B, block_b)
    B_pad = grid_steps * tb
    x_in = x if B_pad == B else jnp.pad(x, ((0, B_pad - B), (0, 0)))

    # VMEM budget: double-buffered x/out tiles + resident weights + temporaries.
    x_elt = jnp.dtype(x.dtype).itemsize
    vmem_est = (
        2 * tb * D_IN * x_elt                         # x tile (double-buffered)
        + 2 * tb * D_OUT_PAD * 2                      # bf16 out tile (double-buffered)
        + (D_IN * D_HID + D_HID * D_OUT_PAD) * 2      # bf16 weights (resident)
        + (D_HID + D_OUT_PAD) * 4                     # f32 biases
        + tb * (D_IN * 2 + D_HID * 6 + D_OUT_PAD * 4)  # in-kernel temporaries
    )
    vmem_limit = int(min(max(int(vmem_est * 1.5), 32 << 20), 60 << 20))

    def build(single_buffer_weights):
        wmode = ({"pipeline_mode": pl.Buffered(1)}
                 if single_buffer_weights else {})
        in_specs = [
            # batch tile of activations
            pl.BlockSpec((tb, D_IN), lambda i: (i, 0)),
            # weights / biases: constant index_map -> VMEM-resident, DMAed once
            # per call; single-buffered (double-buffering them is pure waste).
            pl.BlockSpec((D_IN, D_HID), lambda i: (0, 0), **wmode),
            pl.BlockSpec((1, D_HID), lambda i: (0, 0), **wmode),
            pl.BlockSpec((D_HID, D_OUT_PAD), lambda i: (0, 0), **wmode),
            pl.BlockSpec((1, D_OUT_PAD), lambda i: (0, 0), **wmode),
        ]
        return pl.pallas_call(
            servernet_kernel,
            out_shape=jax.ShapeDtypeStruct((B_pad, D_OUT_PAD), jnp.bfloat16),
            grid_spec=pltpu.PrefetchScalarGridSpec(
                num_scalar_prefetch=0,
                grid=(grid_steps,),
                in_specs=in_specs,
                out_specs=pl.BlockSpec((tb, D_OUT_PAD), lambda i: (i, 0)),
            ),
            compiler_params=pltpu.CompilerParams(
                # batch tiles are independent -> shard across TCs on v7x megacore
                dimension_semantics=("parallel",),
                vmem_limit_bytes=vmem_limit,
            ),
        )

    try:
        out_pad = build(True)(x_in, w1_bf, b1_2d, w2_p, b2_p)
    except Exception:
        # Fallback if this JAX build rejects BlockSpec.pipeline_mode/Buffered(1).
        out_pad = build(False)(x_in, w1_bf, b1_2d, w2_p, b2_p)

    # Strip batch padding and the lane padding of the 10 logits; restore dtype.
    return out_pad[:B, :D_OUT].astype(x.dtype)


def init_params(key):
    # Deterministic init mimicking nn.Linear default: U(-1/sqrt(fan_in), +).
    k1, k2, k3, k4 = jax.random.split(key, 4)
    bound1 = 1.0 / jnp.sqrt(D_IN)
    bound2 = 1.0 / jnp.sqrt(D_HID)
    w1 = jax.random.uniform(k1, (D_IN, D_HID), jnp.float32, -bound1, bound1)
    b1 = jax.random.uniform(k2, (D_HID,), jnp.float32, -bound1, bound1)
    w2 = jax.random.uniform(k3, (D_HID, D_OUT), jnp.float32, -bound2, bound2)
    b2 = jax.random.uniform(k4, (D_OUT,), jnp.float32, -bound2, bound2)
    return w1, b1, w2, b2


def reference_forward_f32(x, w1, b1, w2, b2):
    h = jnp.maximum(x @ w1 + b1, 0.0)
    return h @ w2 + b2


def reference_forward_bf16(x, w1, b1, w2, b2):
    # Mirrors kernel numerics: bf16 matmul inputs, f32 accumulate/bias,
    # bf16 output store.
    xb = x.astype(jnp.bfloat16).astype(jnp.float32)
    w1b = w1.astype(jnp.bfloat16).astype(jnp.float32)
    w2b = w2.astype(jnp.bfloat16).astype(jnp.float32)
    h = jnp.maximum(xb @ w1b + b1, 0.0)
    hb = h.astype(jnp.bfloat16).astype(jnp.float32)
    o = hb @ w2b + b2
    return o.astype(jnp.bfloat16).astype(jnp.float32)


if __name__ == "__main__":
    key = jax.random.PRNGKey(0)
    kx, kp = jax.random.split(key)

    B = 32  # small demo batch
    x = jax.random.normal(kx, (B, D_IN), jnp.float32)
    w1, b1, w2, b2 = init_params(kp)
    params = prepare_params(w1, b1, w2, b2)   # kernel-ready layout, built once

    # Default (large-tile) path: single grid step at this small B.
    out = jax.block_until_ready(servernet_forward(x, params))
    assert out.shape == (B, D_OUT), out.shape
    assert out.dtype == x.dtype, out.dtype

    # Small tile -> 2 grid steps: exercises the batch-tiled, weight-resident path.
    out_tiled = jax.block_until_ready(servernet_forward(x, params, block_b=16))
    assert out_tiled.shape == (B, D_OUT), out_tiled.shape

    # Tight check against a reference with the same bf16 quantization points.
    ref_bf = reference_forward_bf16(x, w1, b1, w2, b2)
    assert jnp.allclose(out, ref_bf, atol=1e-2, rtol=1e-2), \
        "mismatch vs bf16-faithful reference"
    assert jnp.allclose(out_tiled, ref_bf, atol=1e-2, rtol=1e-2), \
        "tiled mismatch vs bf16-faithful reference"

    # Loose sanity check against the pure-f32 PyTorch-equivalent forward.
    ref_f32 = reference_forward_f32(x, w1, b1, w2, b2)
    assert jnp.max(jnp.abs(out - ref_f32)) < 5e-2, "mismatch vs f32 reference"

    print("KERNEL_OK")
</pallas_src>

<mosaic_0001>
module attributes {stable_mosaic.version = 11 : i64} {
  func.func @servernet_kernel(%arg0: i32, %arg1: memref<32x1152xf32, #tpu.memory_space<vmem>>, %arg2: memref<1152x64xbf16, #tpu.memory_space<vmem>>, %arg3: memref<1x64xf32, #tpu.memory_space<vmem>>, %arg4: memref<64x128xbf16, #tpu.memory_space<vmem>>, %arg5: memref<1x128xf32, #tpu.memory_space<vmem>>, %arg6: memref<32x128xbf16, #tpu.memory_space<vmem>>) attributes {dimension_semantics = [#tpu.dimension_semantics<parallel>], iteration_bounds = array<i64: 1>, scalar_prefetch = 0 : i64, scratch_operands = 0 : i64, tpu.core_type = #tpu.core_type<tc>, window_params = [{transform_indices = @transform_0, window_bounds = array<i64: 32, 1152>}, {pipeline_mode = #tpu.pipeline_mode<synchronous>, transform_indices = @transform_1, window_bounds = array<i64: 1152, 64>}, {pipeline_mode = #tpu.pipeline_mode<synchronous>, transform_indices = @transform_2, window_bounds = array<i64: 1, 64>}, {pipeline_mode = #tpu.pipeline_mode<synchronous>, transform_indices = @transform_3, window_bounds = array<i64: 64, 128>}, {pipeline_mode = #tpu.pipeline_mode<synchronous>, transform_indices = @transform_4, window_bounds = array<i64: 1, 128>}, {transform_indices = @transform_5, window_bounds = array<i64: 32, 128>}]} {
    %c0 = arith.constant 0 : index
    %c0_0 = arith.constant 0 : index
    %0 = vector.load %arg1[%c0, %c0_0] : memref<32x1152xf32, #tpu.memory_space<vmem>>, vector<32x1152xf32>
    %1 = arith.truncf %0 : vector<32x1152xf32> to vector<32x1152xbf16>
    %c0_1 = arith.constant 0 : index
    %c0_2 = arith.constant 0 : index
    %2 = vector.load %arg2[%c0_1, %c0_2] : memref<1152x64xbf16, #tpu.memory_space<vmem>>, vector<1152x64xbf16>
    %cst = arith.constant dense<0.000000e+00> : vector<32x64xf32>
    %3 = tpu.matmul %1, %2, %cst {dimension_numbers = #tpu.dot_dimension_numbers<[1], [0], [0], [1], [0, 0, 1, 1], [], []>} : vector<32x1152xbf16>, vector<1152x64xbf16>, vector<32x64xf32> -> vector<32x64xf32>
    %c0_3 = arith.constant 0 : index
    %c0_4 = arith.constant 0 : index
    %4 = vector.load %arg3[%c0_3, %c0_4] : memref<1x64xf32, #tpu.memory_space<vmem>>, vector<1x64xf32>
    %5 = vector.broadcast %4 : vector<1x64xf32> to vector<32x64xf32>
    %6 = arith.addf %3, %5 : vector<32x64xf32>
    %cst_5 = arith.constant 0.000000e+00 : f32
    %7 = vector.broadcast %cst_5 : f32 to vector<32x64xf32>
    %8 = arith.maximumf %6, %7 : vector<32x64xf32>
    %9 = arith.truncf %8 : vector<32x64xf32> to vector<32x64xbf16>
    %c0_6 = arith.constant 0 : index
    %c0_7 = arith.constant 0 : index
    %10 = vector.load %arg4[%c0_6, %c0_7] : memref<64x128xbf16, #tpu.memory_space<vmem>>, vector<64x128xbf16>
    %cst_8 = arith.constant dense<0.000000e+00> : vector<32x128xf32>
    %11 = tpu.matmul %9, %10, %cst_8 {dimension_numbers = #tpu.dot_dimension_numbers<[1], [0], [0], [1], [0, 0, 1, 1], [], []>} : vector<32x64xbf16>, vector<64x128xbf16>, vector<32x128xf32> -> vector<32x128xf32>
    %c0_9 = arith.constant 0 : index
    %c0_10 = arith.constant 0 : index
    %12 = vector.load %arg5[%c0_9, %c0_10] : memref<1x128xf32, #tpu.memory_space<vmem>>, vector<1x128xf32>
    %13 = vector.broadcast %12 : vector<1x128xf32> to vector<32x128xf32>
    %14 = arith.addf %11, %13 : vector<32x128xf32>
    %15 = arith.truncf %14 : vector<32x128xf32> to vector<32x128xbf16>
    %c0_11 = arith.constant 0 : index
    %c0_12 = arith.constant 0 : index
    %16 = vector.load %arg6[%c0_11, %c0_12] : memref<32x128xbf16, #tpu.memory_space<vmem>>, vector<32x128xbf16>
    tpu.vector_store %arg6[%c0_11, %c0_12], %15 {strides = array<i32>} : memref<32x128xbf16, #tpu.memory_space<vmem>>, vector<32x128xbf16>,
    return
  }
  func.func @transform_0(%arg0: i32) -> (i32, i32) {
    %c0_i32 = arith.constant 0 : i32
    %c0_i32_0 = arith.constant 0 : i32
    return %arg0, %c0_i32 : i32, i32
  }
  func.func @transform_1(%arg0: i32) -> (i32, i32) {
    %c0_i32 = arith.constant 0 : i32
    %c0_i32_0 = arith.constant 0 : i32
    %c0_i32_1 = arith.constant 0 : i32
    return %c0_i32, %c0_i32_0 : i32, i32
  }
  func.func @transform_2(%arg0: i32) -> (i32, i32) {
    %c0_i32 = arith.constant 0 : i32
    %c0_i32_0 = arith.constant 0 : i32
    %c0_i32_1 = arith.constant 0 : i32
    return %c0_i32, %c0_i32_0 : i32, i32
  }
  func.func @transform_3(%arg0: i32) -> (i32, i32) {
    %c0_i32 = arith.constant 0 : i32
    %c0_i32_0 = arith.constant 0 : i32
    %c0_i32_1 = arith.constant 0 : i32
    return %c0_i32, %c0_i32_0 : i32, i32
  }
  func.func @transform_4(%arg0: i32) -> (i32, i32) {
    %c0_i32 = arith.constant 0 : i32
    %c0_i32_0 = arith.constant 0 : i32
    %c0_i32_1 = arith.constant 0 : i32
    return %c0_i32, %c0_i32_0 : i32, i32
  }
  func.func @transform_5(%arg0: i32) -> (i32, i32) {
    %c0_i32 = arith.constant 0 : i32
    %c0_i32_0 = arith.constant 0 : i32
    return %arg0, %c0_i32 : i32, i32
  }
}

module attributes {stable_mosaic.version = 11 : i64} {
  func.func @servernet_kernel(%arg0: i32, %arg1: memref<32x1152xf32, #tpu.memory_space<vmem>>, %arg2: memref<1152x64xbf16, #tpu.memory_space<vmem>>, %arg3: memref<1x64xf32, #tpu.memory_space<vmem>>, %arg4: memref<64x128xbf16, #tpu.memory_space<vmem>>, %arg5: memref<1x128xf32, #tpu.memory_space<vmem>>, %arg6: memref<32x128xbf16, #tpu.memory_space<vmem>>) attributes {dimension_semantics = [#tpu.dimension_semantics<parallel>], iteration_bounds = array<i64: 1>, scalar_prefetch = 0 : i64, scratch_operands = 0 : i64, tpu.core_type = #tpu.core_type<tc>, window_params = [{transform_indices = @transform_0, window_bounds = array<i64: 32, 1152>}, {pipeline_mode = #tpu.pipeline_mode<synchronous>, transform_indices = @transform_1, window_bounds = array<i64: 1152, 64>}, {pipeline_mode = #tpu.pipeline_mode<synchronous>, transform_indices = @transform_2, window_bounds = array<i64: 1, 64>}, {pipeline_mode = #tpu.pipeline_mode<synchronous>, transform_indices = @transform_3, window_bounds = array<i64: 64, 128>}, {pipeline_mode = #tpu.pipeline_mode<synchronous>, transform_indices = @transform_4, window_bounds = array<i64: 1, 128>}, {transform_indices = @transform_5, window_bounds = array<i64: 32, 128>}]} {
    %c0 = arith.constant 0 : index
    %c0_0 = arith.constant 0 : index
    %0 = vector.load %arg1[%c0, %c0_0] : memref<32x1152xf32, #tpu.memory_space<vmem>>, vector<32x1152xf32>
    %1 = arith.truncf %0 : vector<32x1152xf32> to vector<32x1152xbf16>
    %c0_1 = arith.constant 0 : index
    %c0_2 = arith.constant 0 : index
    %2 = vector.load %arg2[%c0_1, %c0_2] : memref<1152x64xbf16, #tpu.memory_space<vmem>>, vector<1152x64xbf16>
    %cst = arith.constant dense<0.000000e+00> : vector<32x64xf32>
    %3 = tpu.matmul %1, %2, %cst {dimension_numbers = #tpu.dot_dimension_numbers<[1], [0], [0], [1], [0, 0, 1, 1], [], []>} : vector<32x1152xbf16>, vector<1152x64xbf16>, vector<32x64xf32> -> vector<32x64xf32>
    %c0_3 = arith.constant 0 : index
    %c0_4 = arith.constant 0 : index
    %4 = vector.load %arg3[%c0_3, %c0_4] : memref<1x64xf32, #tpu.memory_space<vmem>>, vector<1x64xf32>
    %5 = vector.broadcast %4 : vector<1x64xf32> to vector<32x64xf32>
    %6 = arith.addf %3, %5 : vector<32x64xf32>
    %cst_5 = arith.constant 0.000000e+00 : f32
    %7 = vector.broadcast %cst_5 : f32 to vector<32x64xf32>
    %8 = arith.maximumf %6, %7 : vector<32x64xf32>
    %9 = arith.truncf %8 : vector<32x64xf32> to vector<32x64xbf16>
    %c0_6 = arith.constant 0 : index
    %c0_7 = arith.constant 0 : index
    %10 = vector.load %arg4[%c0_6, %c0_7] : memref<64x128xbf16, #tpu.memory_space<vmem>>, vector<64x128xbf16>
    %cst_8 = arith.constant dense<0.000000e+00> : vector<32x128xf32>
    %11 = tpu.matmul %9, %10, %cst_8 {dimension_numbers = #tpu.dot_dimension_numbers<[1], [0], [0], [1], [0, 0, 1, 1], [], []>} : vector<32x64xbf16>, vector<64x128xbf16>, vector<32x128xf32> -> vector<32x128xf32>
    %c0_9 = arith.constant 0 : index
    %c0_10 = arith.constant 0 : index
    %12 = vector.load %arg5[%c0_9, %c0_10] : memref<1x128xf32, #tpu.memory_space<vmem>>, vector<1x128xf32>
    %13 = vector.broadcast %12 : vector<1x128xf32> to vector<32x128xf32>
    %14 = arith.addf %11, %13 : vector<32x128xf32>
    %15 = arith.truncf %14 : vector<32x128xf32> to vector<32x128xbf16>
    %c0_11 = arith.constant 0 : index
    %c0_12 = arith.constant 0 : index
    %16 = vector.load %arg6[%c0_11, %c0_12] : memref<32x128xbf16, #tpu.memory_space<vmem>>, vector<32x128xbf16>
    tpu.vector_store %arg6[%c0_11, %c0_12], %15 {strides = array<i32>} : memref<32x128xbf16, #tpu.memory_space<vmem>>, vector<32x128xbf16>,
    return
  }
  func.func @transform_0(%arg0: i32) -> (i32, i32) {
    %c0_i32 = arith.constant 0 : i32
    %c0_i32_0 = arith.constant 0 : i32
    return %arg0, %c0_i32 : i32, i32
  }
  func.func @transform_1(%arg0: i32) -> (i32, i32) {
    %c0_i32 = arith.constant 0 : i32
    %c0_i32_0 = arith.constant 0 : i32
    %c0_i32_1 = arith.constant 0 : i32
    return %c0_i32, %c0_i32_0 : i32, i32
  }
  func.func @transform_2(%arg0: i32) -> (i32, i32) {
    %c0_i32 = arith.constant 0 : i32
    %c0_i32_0 = arith.constant 0 : i32
    %c0_i32_1 = arith.constant 0 : i32
    return %c0_i32, %c0_i32_0 : i32, i32
  }
  func.func @transform_3(%arg0: i32) -> (i32, i32) {
    %c0_i32 = arith.constant 0 : i32
    %c0_i32_0 = arith.constant 0 : i32
    %c0_i32_1 = arith.constant 0 : i32
    return %c0_i32, %c0_i32_0 : i32, i32
  }
  func.func @transform_4(%arg0: i32) -> (i32, i32) {
    %c0_i32 = arith.constant 0 : i32
    %c0_i32_0 = arith.constant 0 : i32
    %c0_i32_1 = arith.constant 0 : i32
    return %c0_i32, %c0_i32_0 : i32, i32
  }
  func.func @transform_5(%arg0: i32) -> (i32, i32) {
    %c0_i32 = arith.constant 0 : i32
    %c0_i32_0 = arith.constant 0 : i32
    return %arg0, %c0_i32 : i32, i32
  }
}

</mosaic_0001>

<bundles_post_ra>
// kernel: tpu_custom_call.1
= control target key start
LH: loop header
LB: loop body
LE: loop exit
PB: predicated region body
PF: predicated region fallthrough
CT: control target
= control target key end

     0   :  { %s1779_s0 = inlined_call_operand.vmem [shape: f32[32,1152], index: 0, kind: input, shape index: {}]   ;;  %s1780_s1 = inlined_call_operand.vmem [shape: bf16[1152,64], index: 1, kind: input, shape index: {}]   ;;  %s1781_s2 = inlined_call_operand.vmem [shape: f32[1,64], index: 2, kind: input, shape index: {}]   ;;  %s1782_s3 = inlined_call_operand.vmem [shape: bf16[64,128], index: 3, kind: input, shape index: {}]   ;;  %s1783_s4 = inlined_call_operand.vmem [shape: f32[1,128], index: 4, kind: input, shape index: {}]   ;;  %s1784_s5 = inlined_call_operand.hbm [shape: bf16[32,128], index: 5, kind: output, shape index: {}]  }
   0x1   :  { %v1303_v0 = vld [vmem:[%s1780_s1 + $0x78] sm:$0xff]   ;;  %v1307_v4 = vld [vmem:[%s1780_s1 + $0x70] sm:$0xff]   ;;  %v1311_v8 = vld [vmem:[%s1780_s1 + $0x68] sm:$0xff]  }
   0x2   :  { %v1304_v1 = vld [vmem:[%s1780_s1 + $0x38] sm:$0xff]   ;;  %1140 = vmatprep.subr.bf16.mxu0 %v1303_v0  ;;  %v1308_v5 = vld [vmem:[%s1780_s1 + $0x30] sm:$0xff]   ;;  %v1312_v9 = vld [vmem:[%s1780_s1 + $0x28] sm:$0xff]  }
   0x3   :  { %v1305_v2 = vld [vmem:[%s1780_s1 + $0xf8] sm:$0xff]   ;;  %1141 = vmatpush3.bf16.msra.mxu0 %v1304_v1  ;;  %v1309_v6 = vld [vmem:[%s1780_s1 + $0xf0] sm:$0xff]   ;;  %v1313_v10 = vld [vmem:[%s1780_s1 + $0xe8] sm:$0xff]  }
   0x4   :  { %v1306_v3 = vld [vmem:[%s1780_s1 + $0xb8] sm:$0xff]   ;;  %1168 = vmatprep.subr.bf16.mxu1 %v1305_v2  ;;  %1142 = vmatprep.subr.bf16.mxu0 %v1307_v4  ;;  %v1310_v7 = vld [vmem:[%s1780_s1 + $0xb0] sm:$0xff]   ;;  %v1314_v11 = vld [vmem:[%s1780_s1 + $0xa8] sm:$0xff]  }
   0x5   :  { %1169 = vmatpush3.bf16.msra.mxu1 %v1306_v3  ;;  %v1315_v12 = vld [vmem:[%s1780_s1 + $0x60] sm:$0xff]   ;;  %v1319_v16 = vld [vmem:[%s1780_s1 + $0x58] sm:$0xff]   ;;  %v1323_v20 = vld [vmem:[%s1780_s1 + $0x50] sm:$0xff]  }
   0x6   :  { %1170 = vmatprep.subr.bf16.mxu1 %v1309_v6  ;;  %v1316_v13 = vld [vmem:[%s1780_s1 + $0x20] sm:$0xff]   ;;  %v1320_v17 = vld [vmem:[%s1780_s1 + $0x18] sm:$0xff]   ;;  %v1324_v21 = vld [vmem:[%s1780_s1 + $0x10] sm:$0xff]  }
   0x7   :  { %1143 = vmatpush3.bf16.msra.mxu0 %v1308_v5  ;;  %v1317_v14 = vld [vmem:[%s1780_s1 + $0xe0] sm:$0xff]   ;;  %v1321_v18 = vld [vmem:[%s1780_s1 + $0xd8] sm:$0xff]   ;;  %v1325_v22 = vld [vmem:[%s1780_s1 + $0xd0] sm:$0xff]  }
   0x8   :  { %1144 = vmatprep.subr.bf16.mxu0 %v1311_v8  ;;  %v1318_v15 = vld [vmem:[%s1780_s1 + $0xa0] sm:$0xff]   ;;  %v1322_v19 = vld [vmem:[%s1780_s1 + $0x98] sm:$0xff]   ;;  %v1326_v23 = vld [vmem:[%s1780_s1 + $0x90] sm:$0xff]  }
   0x9   :  { %1171 = vmatpush3.bf16.msra.mxu1 %v1310_v7  ;;  %v1327_v24 = vld [vmem:[%s1780_s1 + $0x48] sm:$0xff]   ;;  %v1331_v28 = vld [vmem:[%s1780_s1 + $0x40] sm:$0xff]   ;;  %v32_v32 = vld [vmem:[%s1779_s0 + $0x50] sm:$0xff] }
   0xa   :  { %1172 = vmatprep.subr.bf16.mxu1 %v1313_v10  ;;  %v1328_v25 = vld [vmem:[%s1780_s1 + $0x8] sm:$0xff]   ;;  %v1332_v29 = vld [vmem:[%s1780_s1] sm:$0xff]   ;;  %v1335_v38 = vld [vmem:[%s1780_s1 + $0x178] sm:$0xff]  }
   0xb   :  { %1145 = vmatpush3.bf16.msra.mxu0 %v1312_v9  ;;  %v1329_v26 = vld [vmem:[%s1780_s1 + $0xc8] sm:$0xff]   ;;  %v1333_v30 = vld [vmem:[%s1780_s1 + $0xc0] sm:$0xff]   ;;  %v25_v39 = vld [vmem:[%s1779_s0 + $0x18] sm:$0xff] }
   0xc   :  { %1146 = vmatprep.subr.bf16.mxu0 %v1315_v12  ;;  %v1330_v27 = vld [vmem:[%s1780_s1 + $0x88] sm:$0xff]   ;;  %v1334_v34 = vld [vmem:[%s1780_s1 + $0x80] sm:$0xff]   ;;  %v1336_v42 = vld [vmem:[%s1780_s1 + $0x138] sm:$0xff]  }
   0xd   :  { %1173 = vmatpush3.bf16.msra.mxu1 %v1314_v11  ;;  %v23_v31 = vld [vmem:[%s1779_s0 + $0x8] sm:$0xff]  ;;  %v22_v35 = vld [vmem:[%s1779_s0] sm:$0xff]  ;;  %v24_v43 = vld [vmem:[%s1779_s0 + $0x10] sm:$0xff] }
   0xe   :  { %1174 = vmatprep.subr.bf16.mxu1 %v1317_v14  ;;  %v59_v33 = vpack.c.bf16 %v32_v32, %v23_v31  ;;  %v31_v36 = vld [vmem:[%s1779_s0 + $0x48] sm:$0xff]  ;;  %v34_v40 = vld [vmem:[%s1779_s0 + $0x60] sm:$0xff]  ;;  %v33_v44 = vld [vmem:[%s1779_s0 + $0x58] sm:$0xff] }
   0xf   :  { %1147 = vmatpush3.bf16.msra.mxu0 %v1316_v13  ;;  %v58_v37 = vpack.c.bf16 %v31_v36, %v22_v35  ;;  %v61_v41 = vpack.c.bf16 %v34_v40, %v25_v39  ;;  %v60_v45 = vpack.c.bf16 %v33_v44, %v24_v43  ;;  %v1337_v46 = vld [vmem:[%s1780_s1 + $0x1f8] sm:$0xff]   ;;  %v1339_v48 = vld [vmem:[%s1780_s1 + $0x170] sm:$0xff]   ;;  %v1343_v52 = vld [vmem:[%s1780_s1 + $0x168] sm:$0xff]  }
  0x10   :  { %1148 = vmatprep.subr.bf16.mxu0 %v1319_v16  ;;  %691 = vmatprep.mubr.bf16.mxu0 %v59_v33  ;;  %v1338_v47 = vld [vmem:[%s1780_s1 + $0x1b8] sm:$0xff]   ;;  %v1340_v49 = vld [vmem:[%s1780_s1 + $0x130] sm:$0xff]   ;;  %v1344_v53 = vld [vmem:[%s1780_s1 + $0x128] sm:$0xff]  }
  0x11   :  { %1175 = vmatpush3.bf16.msra.mxu1 %v1318_v15  ;;  %740 = vmatprep.mubr.bf16.mxu1 %v61_v41  ;;  %v1341_v50 = vld [vmem:[%s1780_s1 + $0x1f0] sm:$0xff]   ;;  %v1345_v54 = vld [vmem:[%s1780_s1 + $0x1e8] sm:$0xff]   ;;  %v1347_v56 = vld [vmem:[%s1780_s1 + $0x160] sm:$0xff]  }
  0x12   :  { %1176 = vmatprep.subr.bf16.mxu1 %v1321_v18  ;;  %v1342_v51 = vld [vmem:[%s1780_s1 + $0x1b0] sm:$0xff]   ;;  %v1346_v55 = vld [vmem:[%s1780_s1 + $0x1a8] sm:$0xff]   ;;  %v1348_v57 = vld [vmem:[%s1780_s1 + $0x120] sm:$0xff]  }
  0x13   :  { %1149 = vmatpush3.bf16.msra.mxu0 %v1320_v17  ;;  %v1349_v58 = vld [vmem:[%s1780_s1 + $0x1e0] sm:$0xff]   ;;  %v1351_v60 = vld [vmem:[%s1780_s1 + $0x158] sm:$0xff]   ;;  %v40_v2 = vld [vmem:[%s1779_s0 + $0x90] sm:$0xff] }
  0x14   :  { %1150 = vmatprep.subr.bf16.mxu0 %v1323_v20  ;;  %v1350_v59 = vld [vmem:[%s1780_s1 + $0x1a0] sm:$0xff]   ;;  %v1352_v61 = vld [vmem:[%s1780_s1 + $0x118] sm:$0xff]   ;;  %v43_v6 = vld [vmem:[%s1779_s0 + $0xa8] sm:$0xff] }
  0x15   :  { %1177 = vmatpush3.bf16.msra.mxu1 %v1322_v19  ;;  %v41_v62 = vld [vmem:[%s1779_s0 + $0x98] sm:$0xff]  ;;  %v50_v63 = vld [vmem:[%s1779_s0 + $0xe0] sm:$0xff]  ;;  %v52_v7 = vld [vmem:[%s1779_s0 + $0xf0] sm:$0xff] }
  0x16   :  { %1178 = vmatprep.subr.bf16.mxu1 %v1325_v22  ;;  %v68_v0 = vpack.c.bf16 %v50_v63, %v41_v62  ;;  %v1353_v1 = vld [vmem:[%s1780_s1 + $0x1d8] sm:$0xff]   ;;  %v70_v8 = vpack.c.bf16 %v52_v7, %v43_v6  ;;  %v1355_v9 = vld [vmem:[%s1780_s1 + $0x150] sm:$0xff]   ;;  %v42_v10 = vld [vmem:[%s1779_s0 + $0xa0] sm:$0xff] }
  0x17   :  { %1151 = vmatpush3.bf16.msra.mxu0 %v1324_v21  ;;  %v49_v3 = vld [vmem:[%s1779_s0 + $0xd8] sm:$0xff]  ;;  %v51_v11 = vld [vmem:[%s1779_s0 + $0xe8] sm:$0xff]  ;;  %v1356_v13 = vld [vmem:[%s1780_s1 + $0x110] sm:$0xff]  }
  0x18   :  { %1152 = vmatprep.subr.bf16.mxu0 %v1327_v24  ;;  %v67_v4 = vpack.c.bf16 %v49_v3, %v40_v2  ;;  %v1354_v5 = vld [vmem:[%s1780_s1 + $0x198] sm:$0xff]   ;;  %v69_v12 = vpack.c.bf16 %v51_v11, %v42_v10  ;;  %v1357_v14 = vld [vmem:[%s1780_s1 + $0x1d0] sm:$0xff]   ;;  %v1359_v16 = vld [vmem:[%s1780_s1 + $0x148] sm:$0xff]  }
  0x19   :  { %1179 = vmatpush3.bf16.msra.mxu1 %v1326_v23  ;;  %v1358_v15 = vld [vmem:[%s1780_s1 + $0x190] sm:$0xff]   ;;  %v1360_v17 = vld [vmem:[%s1780_s1 + $0x108] sm:$0xff]   ;;  %v1363_v20 = vld [vmem:[%s1780_s1 + $0x140] sm:$0xff]  }
  0x1a   :  { %1180 = vmatprep.subr.bf16.mxu1 %v1329_v26  ;;  %v1361_v18 = vld [vmem:[%s1780_s1 + $0x1c8] sm:$0xff]   ;;  %v1364_v21 = vld [vmem:[%s1780_s1 + $0x100] sm:$0xff]   ;;  %v36_v24 = vld [vmem:[%s1779_s0 + $0x70] sm:$0xff] }
  0x1b   :  { %1153 = vmatpush3.bf16.msra.mxu0 %v1328_v25  ;;  %v1362_v19 = vld [vmem:[%s1780_s1 + $0x188] sm:$0xff]   ;;  %v1365_v22 = vld [vmem:[%s1780_s1 + $0x1c0] sm:$0xff]   ;;  %v29_v31 = vld [vmem:[%s1779_s0 + $0x38] sm:$0xff] }
  0x1c   :  { %1154 = vmatprep.subr.bf16.mxu0 %v1331_v28  ;;  %v27_v23 = vld [vmem:[%s1779_s0 + $0x28] sm:$0xff]  ;;  %v1366_v26 = vld [vmem:[%s1780_s1 + $0x180] sm:$0xff]   ;;  %v28_v33 = vld [vmem:[%s1779_s0 + $0x30] sm:$0xff] }
  0x1d   :  { %1181 = vmatpush3.bf16.msra.mxu1 %v1330_v27  ;;  %v63_v25 = vpack.c.bf16 %v36_v24, %v27_v23  ;;  %v26_v27 = vld [vmem:[%s1779_s0 + $0x20] sm:$0xff]  ;;  %v35_v28 = vld [vmem:[%s1779_s0 + $0x68] sm:$0xff]  ;;  %v44_v40 = vld [vmem:[%s1779_s0 + $0xb0] sm:$0xff] }
  0x1e   :  { %1182 = vmatprep.subr.bf16.mxu1 %v1333_v30  ;;  %v1367_v30 = vld [vmem:[%s1780_s1 + $0x238] sm:$0xff]   ;;  %v38_v32 = vld [vmem:[%s1779_s0 + $0x80] sm:$0xff]  ;;  %v1369_v43 = vld [vmem:[%s1780_s1 + $0x228] sm:$0xff]  }
  0x1f   :  { %1155 = vmatpush3.bf16.msra.mxu0 %v1332_v29  ;;  %v62_v29 = vpack.c.bf16 %v35_v28, %v26_v27  ;;  %v65_v35 = vpack.c.bf16 %v38_v32, %v29_v31  ;;  %v54_v39 = vld [vmem:[%s1779_s0 + $0x100] sm:$0xff]  ;;  %v47_v44 = vld [vmem:[%s1779_s0 + $0xc8] sm:$0xff] }
  0x20   :  { %1196 = vmatprep.subr.bf16.mxu0 %v1335_v38  ;;  %v45_v38 = vld [vmem:[%s1779_s0 + $0xb8] sm:$0xff] }
  0x21   :  { %1183 = vmatpush3.bf16.msra.mxu1 %v1334_v34  ;;  %v37_v34 = vld [vmem:[%s1779_s0 + $0x78] sm:$0xff]  ;;  %v72_v41 = vpack.c.bf16 %v54_v39, %v45_v38 }
  0x22   :  { %692 = vmatmul.mubr.bf16.vlgmr.msra.gmra.mxu0 %v58_v37  ;;  %1224 = vmatprep.subr.bf16.mxu1 %v1337_v46  ;;  %v64_v36 = vpack.c.bf16 %v37_v34, %v28_v33  ;;  %v1368_v37 = vld [vmem:[%s1780_s1 + $0x230] sm:$0xff]  }
  0x23   :  { %1197 = vmatpush3.bf16.msra.mxu0 %v1336_v42  ;;  %699 = vmatprep.mubr.bf16.mxu0 %v68_v0  ;;  %v53_v42 = vld [vmem:[%s1779_s0 + $0xf8] sm:$0xff] }
  0x24   :  { %741 = vmatmul.mubr.bf16.vlgmr.msra.gmra.mxu1 %v60_v45  ;;  %1198 = vmatprep.subr.bf16.mxu0 %v1339_v48  ;;  %v56_v45 = vld [vmem:[%s1779_s0 + $0x110] sm:$0xff]  ;;  %v71_v46 = vpack.c.bf16 %v53_v42, %v44_v40  ;;  %v46_v48 = vld [vmem:[%s1779_s0 + $0xc0] sm:$0xff] }
  0x25   :  { %1225 = vmatpush3.bf16.msra.mxu1 %v1338_v47  ;;  %748 = vmatprep.mubr.bf16.mxu1 %v70_v8  ;;  %v74_v47 = vpack.c.bf16 %v56_v45, %v47_v44 }
  0x26   :  { %1226 = vmatprep.subr.bf16.mxu1 %v1341_v50  ;;  %v1370_v50 = vld [vmem:[%s1780_s1 + $0x220] sm:$0xff]  }
  0x27   :  { %1199 = vmatpush3.bf16.msra.mxu0 %v1340_v49  ;;  %v55_v49 = vld [vmem:[%s1779_s0 + $0x108] sm:$0xff] }
  0x28   :  { %1200 = vmatprep.subr.bf16.mxu0 %v1343_v52  ;;  %v30_v52 = vld [vmem:[%s1779_s0 + $0x40] sm:$0xff] }
  0x29   :  { %1227 = vmatpush3.bf16.msra.mxu1 %v1342_v51  ;;  %v73_v51 = vpack.c.bf16 %v55_v49, %v46_v48 }
  0x2a   :  { %1228 = vmatprep.subr.bf16.mxu1 %v1345_v54  ;;  %700 = vmatmul.mubr.bf16.gmra.mxu0 %v67_v4  ;;  %v39_v54 = vld [vmem:[%s1779_s0 + $0x88] sm:$0xff] }
  0x2b   :  { %1201 = vmatpush3.bf16.msra.mxu0 %v1344_v53  ;;  %789 = vmatprep.mubr.bf16.mxu0 %v63_v25  ;;  %v1371_v53 = vld [vmem:[%s1780_s1 + $0x218] sm:$0xff]  }
  0x2c   :  { %1202 = vmatprep.subr.bf16.mxu0 %v1347_v56  ;;  %749 = vmatmul.mubr.bf16.gmra.mxu1 %v69_v12 }
  0x2d   :  { %1229 = vmatpush3.bf16.msra.mxu1 %v1346_v55  ;;  %838 = vmatprep.mubr.bf16.mxu1 %v65_v35  ;;  %v66_v55 = vpack.c.bf16 %v39_v54, %v30_v52 }
  0x2e   :  { %1230 = vmatprep.subr.bf16.mxu1 %v1349_v58 }
  0x2f   :  { %1203 = vmatpush3.bf16.msra.mxu0 %v1348_v57 }
  0x30   :  { %1204 = vmatprep.subr.bf16.mxu0 %v1351_v60 }
  0x31   :  { %1231 = vmatpush3.bf16.msra.mxu1 %v1350_v59 }
  0x32   :  { %1232 = vmatprep.subr.bf16.mxu1 %v1353_v1 }
  0x33   :  { %1205 = vmatpush3.bf16.msra.mxu0 %v1352_v61 }
  0x34   :  { %1206 = vmatprep.subr.bf16.mxu0 %v1355_v9 }
  0x35   :  { %1233 = vmatpush3.bf16.msra.mxu1 %v1354_v5 }
  0x36   :  { %1234 = vmatprep.subr.bf16.mxu1 %v1357_v14 }
  0x37   :  { %1207 = vmatpush3.bf16.msra.mxu0 %v1356_v13 }
  0x38   :  { %1208 = vmatprep.subr.bf16.mxu0 %v1359_v16 }
  0x39   :  { %1235 = vmatpush3.bf16.msra.mxu1 %v1358_v15 }
  0x3a   :  { %1236 = vmatprep.subr.bf16.mxu1 %v1361_v18 }
  0x3b   :  { %1209 = vmatpush3.bf16.msra.mxu0 %v1360_v17 }
  0x3c   :  { %1210 = vmatprep.subr.bf16.mxu0 %v1363_v20 }
  0x3d   :  { %1237 = vmatpush3.bf16.msra.mxu1 %v1362_v19 }
  0x3e   :  { %1238 = vmatprep.subr.bf16.mxu1 %v1365_v22 }
  0x3f   :  { %1211 = vmatpush3.bf16.msra.mxu0 %v1364_v21 }
  0x40   :  { %1268 = vmatprep.subr.bf16.mxu0 %v1367_v30 }
  0x41   :  { %1239 = vmatpush3.bf16.msra.mxu1 %v1366_v26 }
  0x42   :  { %790 = vmatmul.mubr.bf16.vlgmr.msra.gmra.mxu0 %v62_v29 }
  0x43   :  { %1269 = vmatpush3.bf16.msra.mxu0 %v1367_v30  ;;  %797 = vmatprep.mubr.bf16.mxu0 %v72_v41 }
  0x44   :  { %1270 = vmatprep.subr.bf16.mxu0 %v1368_v37  ;;  %839 = vmatmul.mubr.bf16.vlgmr.msra.gmra.mxu1 %v64_v36 }
  0x45   :  { %846 = vmatprep.mubr.bf16.mxu1 %v74_v47 }
  0x47   :  { %1271 = vmatpush3.bf16.msra.mxu0 %v1368_v37 }
  0x48   :  { %1272 = vmatprep.subr.bf16.mxu0 %v1369_v43 }
  0x4a   :  { %798 = vmatmul.mubr.bf16.gmra.mxu0 %v71_v46 }
  0x4b   :  { %1273 = vmatpush3.bf16.msra.mxu0 %v1369_v43  ;;  %1284 = vmatprep.mubr.bf16.mxu0 %v66_v55 }
  0x4c   :  { %1274 = vmatprep.subr.bf16.mxu0 %v1370_v50  ;;  %847 = vmatmul.mubr.bf16.gmra.mxu1 %v73_v51 }
  0x4f   :  { %1275 = vmatpush3.bf16.msra.mxu0 %v1370_v50 }
  0x50   :  { %10 = vsyncpa [#allocation3], 0  ;;  %1276 = vmatprep.subr.bf16.mxu0 %v1371_v53  ;;  %v1372_v56 = vld [vmem:[%s1780_s1 + $0x210] sm:$0xff]   ;;  %v1373_v57 = vld [vmem:[%s1780_s1 + $0x208] sm:$0xff]   ;;  %vm949_vm0 = vcmask 523264   ;;  %s1401_s17 = smov [#allocation2]  }
  0x51   :  { %v1374_v58 = vld [vmem:[%s1780_s1 + $0x200] sm:$0xff]   ;;  %v48_v59 = vld [vmem:[%s1779_s0 + $0xd0] sm:$0xff]  ;;  %v57_v60 = vld [vmem:[%s1779_s0 + $0x118] sm:$0xff]  ;;  %s1030_s18 = sshll.u32 %s1401_s17, 4  ;;  %s1031_s18 = int_to_ptr.vmem [resolvable:$true] %s1030_s18 }
  0x52   :  { %v75_v61 = vpack.c.bf16 %v57_v60, %v48_v59  ;;  %v1375_v62 = vld [vmem:[%s1782_s3 + $0x18] sm:$0xff]   ;;  %v1376_v63 = vld [vmem:[%s1782_s3 + $0x10] sm:$0xff]   ;;  %v1377_v0 = vld [vmem:[%s1782_s3 + $0x8] sm:$0xff]   ;;  %s1379_s19 = scalar_lea.vmem %s1031_s18, 256  ;;  %p1384_p1 = scmp.lt.s32.totalorder %s1031_s18, %s1031_s18 }
  0x53   :  { %1277 = vmatpush3.bf16.msra.mxu0 %v1371_v53  ;;  %1288 = vmatprep.subr.bf16.mxu1 %v1375_v62  ;;  %v1378_v1 = vld [vmem:[%s1782_s3] sm:$0xff]   ;;  %p1380_p0 = scmp.ne.s32.totalorder %s1031_s18, %s1379_s19  ;;  %p1385_p2 = scmp.lt.s32.totalorder %s1379_s19, %s1379_s19 }
  0x54   :  { %1278 = vmatprep.subr.bf16.mxu0 %v1372_v56  ;;  %1289 = vmatpush3.bf16.msra.mxu1 %v1375_v62  ;;  %v1041_v33 = vld [vmem:[%s1781_s2] ss:$0 sm:$0xff] }
  0x55   :  { %1290 = vmatprep.subr.bf16.mxu1 %v1376_v63  ;;  %p1386_p3 = por %p1385_p2, %p1384_p1 }
  0x57   :  { %1279 = vmatpush3.bf16.msra.mxu0 %v1372_v56  ;;  %p1387_p4 = pnand %p1386_p3, %p1380_p0 }
  0x58   :  { %1280 = vmatprep.subr.bf16.mxu0 %v1373_v57  ;;  %1291 = vmatpush3.bf16.msra.mxu1 %v1376_v63 }
  0x59   :  { %1292 = vmatprep.subr.bf16.mxu1 %v1377_v0 }
  0x5b   :  { %1281 = vmatpush3.bf16.msra.mxu0 %v1373_v57 }
  0x5c   :  { %1282 = vmatprep.subr.bf16.mxu0 %v1374_v58  ;;  %1293 = vmatpush3.bf16.msra.mxu1 %v1377_v0 }
  0x5d   :  { %1294 = vmatprep.subr.bf16.mxu1 %v1378_v1 }
  0x5f   :  { %1283 = vmatpush3.bf16.msra.mxu0 %v1374_v58 }
  0x60   :  { %1295 = vmatpush3.bf16.msra.mxu1 %v1378_v1 }
  0x62   :  { %1285 = vmatmul.mubr.bf16.vlgmr.msra.gmra.mxu0 %v75_v61 }
  0xe2   :  { %v1156_v2 = vpop.f32.mrf.mxu0 }
  0xe4   :  { %v1184_v3 = vpop.f32.mrf.mxu1  ;;  %v1157_v4 = vpop.f32.mrf.mxu0 }
  0xe5   :  { %v1158_v31 = vadd.f32 %v1157_v4, %v1156_v2 }
  0xe6   :  { %v1185_v5 = vpop.f32.mrf.mxu1  ;;  %v1159_v6 = vpop.f32.mrf.mxu0 }
  0xe7   :  { %v694_v38 = vadd.f32 %v1158_v31, %v1041_v33  ;;  %v1186_v39 = vadd.f32 %v1185_v5, %v1184_v3 }
  0xe8   :  { %v1187_v7 = vpop.f32.mrf.mxu1  ;;  %v1160_v8 = vpop.f32.mrf.mxu0 }
  0xe9   :  { %v1161_v34 = vadd.f32 %v1160_v8, %v1159_v6  ;;  %v743_v50 = vadd.f32 %v1186_v39, %v694_v38 }
  0xea   :  { %v1162_v9 = vpop.f32.mrf.mxu0  ;;  %v1188_v10 = vpop.f32.mrf.mxu1 }
  0xeb   :  { %v697_v42 = vadd.f32 %v1161_v34, %v1041_v33  ;;  %v1189_v43 = vadd.f32 %v1188_v10, %v1187_v7 }
  0xec   :  { %v1190_v11 = vpop.f32.mrf.mxu1  ;;  %v1163_v12 = vpop.f32.mrf.mxu0 }
  0xed   :  { %v1164_v35 = vadd.f32 %v1163_v12, %v1162_v9  ;;  %v746_v53 = vadd.f32 %v1189_v43, %v697_v42 }
  0xee   :  { %v1191_v13 = vpop.f32.mrf.mxu1  ;;  %v1165_v14 = vpop.f32.mrf.mxu0 }
  0xef   :  { %v702_v44 = vadd.f32 %v1164_v35, %v1041_v33  ;;  %v1192_v45 = vadd.f32 %v1191_v13, %v1190_v11 }
  0xf0   :  { %v1193_v15 = vpop.f32.mrf.mxu1  ;;  %v1166_v16 = vpop.f32.mrf.mxu0 }
  0xf1   :  { %v1167_v32 = vadd.f32 %v1166_v16, %v1165_v14  ;;  %v751_v54 = vadd.f32 %v1192_v45, %v702_v44 }
  0xf2   :  { %v1194_v18 = vpop.f32.mrf.mxu1 }
  0xf3   :  { %v705_v40 = vadd.f32 %v1167_v32, %v1041_v33  ;;  %v1195_v41 = vadd.f32 %v1194_v18, %v1193_v15  ;;  %v1114_v18 = vld [vmem:[%s1783_s4] ss:$0 sm:$0xff] }
  0xf5   :  { %v754_v51 = vadd.f32 %v1195_v41, %v705_v40 }
 0x102   :  { %v1212_v17 = vpop.f32.mrf.mxu0 }
 0x104   :  { %v1213_v19 = vpop.f32.mrf.mxu0  ;;  %v1240_v20 = vpop.f32.mrf.mxu1 }
 0x105   :  { %v1214_v46 = vadd.f32 %v1213_v19, %v1212_v17 }
 0x106   :  { %v1215_v21 = vpop.f32.mrf.mxu0  ;;  %v1241_v22 = vpop.f32.mrf.mxu1 }
 0x107   :  { %v792_v55 = vadd.f32 %v1214_v46, %v743_v50  ;;  %v1242_v56 = vadd.f32 %v1241_v22, %v1240_v20 }
 0x108   :  { %v1216_v23 = vpop.f32.mrf.mxu0  ;;  %v1243_v24 = vpop.f32.mrf.mxu1 }
 0x109   :  { %v1217_v52 = vadd.f32 %v1216_v23, %v1215_v21  ;;  %v841_v1 = vadd.f32 %v1242_v56, %v792_v55 }
 0x10a   :  { %v1218_v25 = vpop.f32.mrf.mxu0  ;;  %v1244_v26 = vpop.f32.mrf.mxu1 }
 0x10b   :  { %v795_v62 = vadd.f32 %v1217_v52, %v746_v53  ;;  %v1245_v63 = vadd.f32 %v1244_v26, %v1243_v24 }
 0x10c   :  { %v1219_v27 = vpop.f32.mrf.mxu0  ;;  %v1246_v28 = vpop.f32.mrf.mxu1 }
 0x10d   :  { %v1220_v48 = vadd.f32 %v1219_v27, %v1218_v25  ;;  %v844_v7 = vadd.f32 %v1245_v63, %v795_v62 }
 0x10e   :  { %v1221_v29 = vpop.f32.mrf.mxu0  ;;  %v1247_v30 = vpop.f32.mrf.mxu1 }
 0x10f   :  { %v800_v59 = vadd.f32 %v1220_v48, %v751_v54  ;;  %v1248_v60 = vadd.f32 %v1247_v30, %v1246_v28 }
 0x110   :  { %v1222_v36 = vpop.f32.mrf.mxu0  ;;  %v1249_v37 = vpop.f32.mrf.mxu1 }
 0x111   :  { %v1223_v47 = vadd.f32 %v1222_v36, %v1221_v29  ;;  %v849_v3 = vadd.f32 %v1248_v60, %v800_v59 }
 0x112   :  { %v1250_v49 = vpop.f32.mrf.mxu1 }
 0x113   :  { %v803_v57 = vadd.f32 %v1223_v47, %v754_v51  ;;  %v1251_v58 = vadd.f32 %v1250_v49, %v1249_v37 }
 0x115   :  { %v852_v2 = vadd.f32 %v1251_v58, %v803_v57 }
 0x122   :  { %v1286_v61 = vpop.f32.mrf.mxu0 }
 0x123   :  { %v898_v8 = vadd.f32 %v1286_v61, %v849_v3 }
 0x124   :  { %v889_v0 = vpop.f32.mrf.mxu0 }
 0x125   :  { %v890_v5 = vadd.f32 %v889_v0, %v841_v1  ;;  %v906_v14 = vmax.f32 %v898_v8, 0.0 }
 0x126   :  { %v1287_v4 = vpop.f32.mrf.mxu0 }
 0x127   :  { %v901_v6 = vadd.f32 %v1287_v4, %v852_v2  ;;  %v904_v12 = vmax.f32 %v890_v5, 0.0 }
 0x128   :  { %v892_v9 = vpop.f32.mrf.mxu0 }
 0x129   :  { %v893_v10 = vadd.f32 %v892_v9, %v844_v7  ;;  %v907_v11 = vmax.f32 %v901_v6, 0.0 }
 0x12b   :  { %v905_v13 = vmax.f32 %v893_v10, 0.0  ;;  %v909_v16 = vpack.c.bf16 %v907_v11, %v906_v14 }
 0x12d   :  { %v908_v15 = vpack.c.bf16 %v905_v13, %v904_v12 }
 0x12f   :  { %1296 = vmatprep.mubr.msk.bf16.mxu1 %vm949_vm0, %v908_v15 }
 0x130   :  { %1297 = vmatmul.mubr.msk.bf16.vlgmr.msra.gmra.mxu1 %vm949_vm0, %v909_v16 }
 0x1f0   :  { %v1298_v17 = vpop.f32.mrf.mxu1 }
 0x1f1   :  { %v999_v21 = vadd.f32 %v1298_v17, %v1114_v18 }
 0x1f2   :  { %v990_v19 = vpop.f32.mrf.mxu1 }
 0x1f3   :  { %v991_v24 = vadd.f32 %v1114_v18, %v990_v19 }
 0x1f4   :  { %v1299_v20 = vpop.f32.mrf.mxu1 }
 0x1f5   :  { %v1002_v22 = vadd.f32 %v1299_v20, %v1114_v18 }
 0x1f6   :  { %v993_v23 = vpop.f32.mrf.mxu1 }
 0x1f7   :  { %v1137_v25 = vpack.c.bf16 %v1002_v22, %v999_v21  ;;  %v994_v26 = vadd.f32 %v1114_v18, %v993_v23 }
 0x1f9   :  { %1139 = vst [vmem:[#allocation2 + $0x8] sm:$0xff] %v1137_v25   ;;  %v1132_v27 = vpack.c.bf16 %v994_v26, %v991_v24 }
 0x1fb   :  { %1133 = vst [vmem:[#allocation2] sm:$0xff] %v1132_v27  }
 0x1fc   :  { %1390 = shalt.err (!%p1387_p4)
}
 0x1fd   :  { %s1402_s4 = smov 64   ;;  %s1403_s20 = smov 4  }
 0x1fe   :  { %1036 = dma.vmem_to_hbm [thread:$0]  %s1031_s18, 256, %s1784_s5, [#allocation3], %s1402_s4, %s1402_s4, %s1403_s20  }
 0x1ff   :  { %1399 = dma.done.wait [#allocation3], 256  }
 0x200   :  { %1400 = vsyncadd [#allocation3], 4294967040 }
 0x201   :  { %1040 = vsyncpa [#allocation3], 1 }

// kernel: tpu_custom_call.1
= control target key start
LH: loop header
LB: loop body
LE: loop exit
PB: predicated region body
PF: predicated region fallthrough
CT: control target
= control target key end

     0   :  { %s1779_s0 = inlined_call_operand.vmem [shape: f32[32,1152], index: 0, kind: input, shape index: {}]   ;;  %s1780_s1 = inlined_call_operand.vmem [shape: bf16[1152,64], index: 1, kind: input, shape index: {}]   ;;  %s1781_s2 = inlined_call_operand.vmem [shape: f32[1,64], index: 2, kind: input, shape index: {}]   ;;  %s1782_s3 = inlined_call_operand.vmem [shape: bf16[64,128], index: 3, kind: input, shape index: {}]   ;;  %s1783_s4 = inlined_call_operand.vmem [shape: f32[1,128], index: 4, kind: input, shape index: {}]   ;;  %s1784_s5 = inlined_call_operand.hbm [shape: bf16[32,128], index: 5, kind: output, shape index: {}]  }
   0x1   :  { %v1303_v0 = vld [vmem:[%s1780_s1 + $0x78] sm:$0xff]   ;;  %v1307_v4 = vld [vmem:[%s1780_s1 + $0x70] sm:$0xff]   ;;  %v1311_v8 = vld [vmem:[%s1780_s1 + $0x68] sm:$0xff]  }
   0x2   :  { %v1304_v1 = vld [vmem:[%s1780_s1 + $0x38] sm:$0xff]   ;;  %1140 = vmatprep.subr.bf16.mxu0 %v1303_v0  ;;  %v1308_v5 = vld [vmem:[%s1780_s1 + $0x30] sm:$0xff]   ;;  %v1312_v9 = vld [vmem:[%s1780_s1 + $0x28] sm:$0xff]  }
   0x3   :  { %v1305_v2 = vld [vmem:[%s1780_s1 + $0xf8] sm:$0xff]   ;;  %1141 = vmatpush3.bf16.msra.mxu0 %v1304_v1  ;;  %v1309_v6 = vld [vmem:[%s1780_s1 + $0xf0] sm:$0xff]   ;;  %v1313_v10 = vld [vmem:[%s1780_s1 + $0xe8] sm:$0xff]  }
   0x4   :  { %v1306_v3 = vld [vmem:[%s1780_s1 + $0xb8] sm:$0xff]   ;;  %1168 = vmatprep.subr.bf16.mxu1 %v1305_v2  ;;  %1142 = vmatprep.subr.bf16.mxu0 %v1307_v4  ;;  %v1310_v7 = vld [vmem:[%s1780_s1 + $0xb0] sm:$0xff]   ;;  %v1314_v11 = vld [vmem:[%s1780_s1 + $0xa8] sm:$0xff]  }
   0x5   :  { %1169 = vmatpush3.bf16.msra.mxu1 %v1306_v3  ;;  %v1315_v12 = vld [vmem:[%s1780_s1 + $0x60] sm:$0xff]   ;;  %v1319_v16 = vld [vmem:[%s1780_s1 + $0x58] sm:$0xff]   ;;  %v1323_v20 = vld [vmem:[%s1780_s1 + $0x50] sm:$0xff]  }
   0x6   :  { %1170 = vmatprep.subr.bf16.mxu1 %v1309_v6  ;;  %v1316_v13 = vld [vmem:[%s1780_s1 + $0x20] sm:$0xff]   ;;  %v1320_v17 = vld [vmem:[%s1780_s1 + $0x18] sm:$0xff]   ;;  %v1324_v21 = vld [vmem:[%s1780_s1 + $0x10] sm:$0xff]  }
   0x7   :  { %1143 = vmatpush3.bf16.msra.mxu0 %v1308_v5  ;;  %v1317_v14 = vld [vmem:[%s1780_s1 + $0xe0] sm:$0xff]   ;;  %v1321_v18 = vld [vmem:[%s1780_s1 + $0xd8] sm:$0xff]   ;;  %v1325_v22 = vld [vmem:[%s1780_s1 + $0xd0] sm:$0xff]  }
   0x8   :  { %1144 = vmatprep.subr.bf16.mxu0 %v1311_v8  ;;  %v1318_v15 = vld [vmem:[%s1780_s1 + $0xa0] sm:$0xff]   ;;  %v1322_v19 = vld [vmem:[%s1780_s1 + $0x98] sm:$0xff]   ;;  %v1326_v23 = vld [vmem:[%s1780_s1 + $0x90] sm:$0xff]  }
   0x9   :  { %1171 = vmatpush3.bf16.msra.mxu1 %v1310_v7  ;;  %v1327_v24 = vld [vmem:[%s1780_s1 + $0x48] sm:$0xff]   ;;  %v1331_v28 = vld [vmem:[%s1780_s1 + $0x40] sm:$0xff]   ;;  %v32_v32 = vld [vmem:[%s1779_s0 + $0x50] sm:$0xff] }
   0xa   :  { %1172 = vmatprep.subr.bf16.mxu1 %v1313_v10  ;;  %v1328_v25 = vld [vmem:[%s1780_s1 + $0x8] sm:$0xff]   ;;  %v1332_v29 = vld [vmem:[%s1780_s1] sm:$0xff]   ;;  %v1335_v38 = vld [vmem:[%s1780_s1 + $0x178] sm:$0xff]  }
   0xb   :  { %1145 = vmatpush3.bf16.msra.mxu0 %v1312_v9  ;;  %v1329_v26 = vld [vmem:[%s1780_s1 + $0xc8] sm:$0xff]   ;;  %v1333_v30 = vld [vmem:[%s1780_s1 + $0xc0] sm:$0xff]   ;;  %v25_v39 = vld [vmem:[%s1779_s0 + $0x18] sm:$0xff] }
   0xc   :  { %1146 = vmatprep.subr.bf16.mxu0 %v1315_v12  ;;  %v1330_v27 = vld [vmem:[%s1780_s1 + $0x88] sm:$0xff]   ;;  %v1334_v34 = vld [vmem:[%s1780_s1 + $0x80] sm:$0xff]   ;;  %v1336_v42 = vld [vmem:[%s1780_s1 + $0x138] sm:$0xff]  }
   0xd   :  { %1173 = vmatpush3.bf16.msra.mxu1 %v1314_v11  ;;  %v23_v31 = vld [vmem:[%s1779_s0 + $0x8] sm:$0xff]  ;;  %v22_v35 = vld [vmem:[%s1779_s0] sm:$0xff]  ;;  %v24_v43 = vld [vmem:[%s1779_s0 + $0x10] sm:$0xff] }
   0xe   :  { %1174 = vmatprep.subr.bf16.mxu1 %v1317_v14  ;;  %v59_v33 = vpack.c.bf16 %v32_v32, %v23_v31  ;;  %v31_v36 = vld [vmem:[%s1779_s0 + $0x48] sm:$0xff]  ;;  %v34_v40 = vld [vmem:[%s1779_s0 + $0x60] sm:$0xff]  ;;  %v33_v44 = vld [vmem:[%s1779_s0 + $0x58] sm:$0xff] }
   0xf   :  { %1147 = vmatpush3.bf16.msra.mxu0 %v1316_v13  ;;  %v58_v37 = vpack.c.bf16 %v31_v36, %v22_v35  ;;  %v61_v41 = vpack.c.bf16 %v34_v40, %v25_v39  ;;  %v60_v45 = vpack.c.bf16 %v33_v44, %v24_v43  ;;  %v1337_v46 = vld [vmem:[%s1780_s1 + $0x1f8] sm:$0xff]   ;;  %v1339_v48 = vld [vmem:[%s1780_s1 + $0x170] sm:$0xff]   ;;  %v1343_v52 = vld [vmem:[%s1780_s1 + $0x168] sm:$0xff]  }
  0x10   :  { %1148 = vmatprep.subr.bf16.mxu0 %v1319_v16  ;;  %691 = vmatprep.mubr.bf16.mxu0 %v59_v33  ;;  %v1338_v47 = vld [vmem:[%s1780_s1 + $0x1b8] sm:$0xff]   ;;  %v1340_v49 = vld [vmem:[%s1780_s1 + $0x130] sm:$0xff]   ;;  %v1344_v53 = vld [vmem:[%s1780_s1 + $0x128] sm:$0xff]  }
  0x11   :  { %1175 = vmatpush3.bf16.msra.mxu1 %v1318_v15  ;;  %740 = vmatprep.mubr.bf16.mxu1 %v61_v41  ;;  %v1341_v50 = vld [vmem:[%s1780_s1 + $0x1f0] sm:$0xff]   ;;  %v1345_v54 = vld [vmem:[%s1780_s1 + $0x1e8] sm:$0xff]   ;;  %v1347_v56 = vld [vmem:[%s1780_s1 + $0x160] sm:$0xff]  }
  0x12   :  { %1176 = vmatprep.subr.bf16.mxu1 %v1321_v18  ;;  %v1342_v51 = vld [vmem:[%s1780_s1 + $0x1b0] sm:$0xff]   ;;  %v1346_v55 = vld [vmem:[%s1780_s1 + $0x1a8] sm:$0xff]   ;;  %v1348_v57 = vld [vmem:[%s1780_s1 + $0x120] sm:$0xff]  }
  0x13   :  { %1149 = vmatpush3.bf16.msra.mxu0 %v1320_v17  ;;  %v1349_v58 = vld [vmem:[%s1780_s1 + $0x1e0] sm:$0xff]   ;;  %v1351_v60 = vld [vmem:[%s1780_s1 + $0x158] sm:$0xff]   ;;  %v40_v2 = vld [vmem:[%s1779_s0 + $0x90] sm:$0xff] }
  0x14   :  { %1150 = vmatprep.subr.bf16.mxu0 %v1323_v20  ;;  %v1350_v59 = vld [vmem:[%s1780_s1 + $0x1a0] sm:$0xff]   ;;  %v1352_v61 = vld [vmem:[%s1780_s1 + $0x118] sm:$0xff]   ;;  %v43_v6 = vld [vmem:[%s1779_s0 + $0xa8] sm:$0xff] }
  0x15   :  { %1177 = vmatpush3.bf16.msra.mxu1 %v1322_v19  ;;  %v41_v62 = vld [vmem:[%s1779_s0 + $0x98] sm:$0xff]  ;;  %v50_v63 = vld [vmem:[%s1779_s0 + $0xe0] sm:$0xff]  ;;  %v52_v7 = vld [vmem:[%s1779_s0 + $0xf0] sm:$0xff] }
  0x16   :  { %1178 = vmatprep.subr.bf16.mxu1 %v1325_v22  ;;  %v68_v0 = vpack.c.bf16 %v50_v63, %v41_v62  ;;  %v1353_v1 = vld [vmem:[%s1780_s1 + $0x1d8] sm:$0xff]   ;;  %v70_v8 = vpack.c.bf16 %v52_v7, %v43_v6  ;;  %v1355_v9 = vld [vmem:[%s1780_s1 + $0x150] sm:$0xff]   ;;  %v42_v10 = vld [vmem:[%s1779_s0 + $0xa0] sm:$0xff] }
  0x17   :  { %1151 = vmatpush3.bf16.msra.mxu0 %v1324_v21  ;;  %v49_v3 = vld [vmem:[%s1779_s0 + $0xd8] sm:$0xff]  ;;  %v51_v11 = vld [vmem:[%s1779_s0 + $0xe8] sm:$0xff]  ;;  %v1356_v13 = vld [vmem:[%s1780_s1 + $0x110] sm:$0xff]  }
  0x18   :  { %1152 = vmatprep.subr.bf16.mxu0 %v1327_v24  ;;  %v67_v4 = vpack.c.bf16 %v49_v3, %v40_v2  ;;  %v1354_v5 = vld [vmem:[%s1780_s1 + $0x198] sm:$0xff]   ;;  %v69_v12 = vpack.c.bf16 %v51_v11, %v42_v10  ;;  %v1357_v14 = vld [vmem:[%s1780_s1 + $0x1d0] sm:$0xff]   ;;  %v1359_v16 = vld [vmem:[%s1780_s1 + $0x148] sm:$0xff]  }
  0x19   :  { %1179 = vmatpush3.bf16.msra.mxu1 %v1326_v23  ;;  %v1358_v15 = vld [vmem:[%s1780_s1 + $0x190] sm:$0xff]   ;;  %v1360_v17 = vld [vmem:[%s1780_s1 + $0x108] sm:$0xff]   ;;  %v1363_v20 = vld [vmem:[%s1780_s1 + $0x140] sm:$0xff]  }
  0x1a   :  { %1180 = vmatprep.subr.bf16.mxu1 %v1329_v26  ;;  %v1361_v18 = vld [vmem:[%s1780_s1 + $0x1c8] sm:$0xff]   ;;  %v1364_v21 = vld [vmem:[%s1780_s1 + $0x100] sm:$0xff]   ;;  %v36_v24 = vld [vmem:[%s1779_s0 + $0x70] sm:$0xff] }
  0x1b   :  { %1153 = vmatpush3.bf16.msra.mxu0 %v1328_v25  ;;  %v1362_v19 = vld [vmem:[%s1780_s1 + $0x188] sm:$0xff]   ;;  %v1365_v22 = vld [vmem:[%s1780_s1 + $0x1c0] sm:$0xff]   ;;  %v29_v31 = vld [vmem:[%s1779_s0 + $0x38] sm:$0xff] }
  0x1c   :  { %1154 = vmatprep.subr.bf16.mxu0 %v1331_v28  ;;  %v27_v23 = vld [vmem:[%s1779_s0 + $0x28] sm:$0xff]  ;;  %v1366_v26 = vld [vmem:[%s1780_s1 + $0x180] sm:$0xff]   ;;  %v28_v33 = vld [vmem:[%s1779_s0 + $0x30] sm:$0xff] }
  0x1d   :  { %1181 = vmatpush3.bf16.msra.mxu1 %v1330_v27  ;;  %v63_v25 = vpack.c.bf16 %v36_v24, %v27_v23  ;;  %v26_v27 = vld [vmem:[%s1779_s0 + $0x20] sm:$0xff]  ;;  %v35_v28 = vld [vmem:[%s1779_s0 + $0x68] sm:$0xff]  ;;  %v44_v40 = vld [vmem:[%s1779_s0 + $0xb0] sm:$0xff] }
  0x1e   :  { %1182 = vmatprep.subr.bf16.mxu1 %v1333_v30  ;;  %v1367_v30 = vld [vmem:[%s1780_s1 + $0x238] sm:$0xff]   ;;  %v38_v32 = vld [vmem:[%s1779_s0 + $0x80] sm:$0xff]  ;;  %v1369_v43 = vld [vmem:[%s1780_s1 + $0x228] sm:$0xff]  }
  0x1f   :  { %1155 = vmatpush3.bf16.msra.mxu0 %v1332_v29  ;;  %v62_v29 = vpack.c.bf16 %v35_v28, %v26_v27  ;;  %v65_v35 = vpack.c.bf16 %v38_v32, %v29_v31  ;;  %v54_v39 = vld [vmem:[%s1779_s0 + $0x100] sm:$0xff]  ;;  %v47_v44 = vld [vmem:[%s1779_s0 + $0xc8] sm:$0xff] }
  0x20   :  { %1196 = vmatprep.subr.bf16.mxu0 %v1335_v38  ;;  %v45_v38 = vld [vmem:[%s1779_s0 + $0xb8] sm:$0xff] }
  0x21   :  { %1183 = vmatpush3.bf16.msra.mxu1 %v1334_v34  ;;  %v37_v34 = vld [vmem:[%s1779_s0 + $0x78] sm:$0xff]  ;;  %v72_v41 = vpack.c.bf16 %v54_v39, %v45_v38 }
  0x22   :  { %692 = vmatmul.mubr.bf16.vlgmr.msra.gmra.mxu0 %v58_v37  ;;  %1224 = vmatprep.subr.bf16.mxu1 %v1337_v46  ;;  %v64_v36 = vpack.c.bf16 %v37_v34, %v28_v33  ;;  %v1368_v37 = vld [vmem:[%s1780_s1 + $0x230] sm:$0xff]  }
  0x23   :  { %1197 = vmatpush3.bf16.msra.mxu0 %v1336_v42  ;;  %699 = vmatprep.mubr.bf16.mxu0 %v68_v0  ;;  %v53_v42 = vld [vmem:[%s1779_s0 + $0xf8] sm:$0xff] }
  0x24   :  { %741 = vmatmul.mubr.bf16.vlgmr.msra.gmra.mxu1 %v60_v45  ;;  %1198 = vmatprep.subr.bf16.mxu0 %v1339_v48  ;;  %v56_v45 = vld [vmem:[%s1779_s0 + $0x110] sm:$0xff]  ;;  %v71_v46 = vpack.c.bf16 %v53_v42, %v44_v40  ;;  %v46_v48 = vld [vmem:[%s1779_s0 + $0xc0] sm:$0xff] }
  0x25   :  { %1225 = vmatpush3.bf16.msra.mxu1 %v1338_v47  ;;  %748 = vmatprep.mubr.bf16.mxu1 %v70_v8  ;;  %v74_v47 = vpack.c.bf16 %v56_v45, %v47_v44 }
  0x26   :  { %1226 = vmatprep.subr.bf16.mxu1 %v1341_v50  ;;  %v1370_v50 = vld [vmem:[%s1780_s1 + $0x220] sm:$0xff]  }
  0x27   :  { %1199 = vmatpush3.bf16.msra.mxu0 %v1340_v49  ;;  %v55_v49 = vld [vmem:[%s1779_s0 + $0x108] sm:$0xff] }
  0x28   :  { %1200 = vmatprep.subr.bf16.mxu0 %v1343_v52  ;;  %v30_v52 = vld [vmem:[%s1779_s0 + $0x40] sm:$0xff] }
  0x29   :  { %1227 = vmatpush3.bf16.msra.mxu1 %v1342_v51  ;;  %v73_v51 = vpack.c.bf16 %v55_v49, %v46_v48 }
  0x2a   :  { %1228 = vmatprep.subr.bf16.mxu1 %v1345_v54  ;;  %700 = vmatmul.mubr.bf16.gmra.mxu0 %v67_v4  ;;  %v39_v54 = vld [vmem:[%s1779_s0 + $0x88] sm:$0xff] }
  0x2b   :  { %1201 = vmatpush3.bf16.msra.mxu0 %v1344_v53  ;;  %789 = vmatprep.mubr.bf16.mxu0 %v63_v25  ;;  %v1371_v53 = vld [vmem:[%s1780_s1 + $0x218] sm:$0xff]  }
  0x2c   :  { %1202 = vmatprep.subr.bf16.mxu0 %v1347_v56  ;;  %749 = vmatmul.mubr.bf16.gmra.mxu1 %v69_v12 }
  0x2d   :  { %1229 = vmatpush3.bf16.msra.mxu1 %v1346_v55  ;;  %838 = vmatprep.mubr.bf16.mxu1 %v65_v35  ;;  %v66_v55 = vpack.c.bf16 %v39_v54, %v30_v52 }
  0x2e   :  { %1230 = vmatprep.subr.bf16.mxu1 %v1349_v58 }
  0x2f   :  { %1203 = vmatpush3.bf16.msra.mxu0 %v1348_v57 }
  0x30   :  { %1204 = vmatprep.subr.bf16.mxu0 %v1351_v60 }
  0x31   :  { %1231 = vmatpush3.bf16.msra.mxu1 %v1350_v59 }
  0x32   :  { %1232 = vmatprep.subr.bf16.mxu1 %v1353_v1 }
  0x33   :  { %1205 = vmatpush3.bf16.msra.mxu0 %v1352_v61 }
  0x34   :  { %1206 = vmatprep.subr.bf16.mxu0 %v1355_v9 }
  0x35   :  { %1233 = vmatpush3.bf16.msra.mxu1 %v1354_v5 }
  0x36   :  { %1234 = vmatprep.subr.bf16.mxu1 %v1357_v14 }
  0x37   :  { %1207 = vmatpush3.bf16.msra.mxu0 %v1356_v13 }
  0x38   :  { %1208 = vmatprep.subr.bf16.mxu0 %v1359_v16 }
  0x39   :  { %1235 = vmatpush3.bf16.msra.mxu1 %v1358_v15 }
  0x3a   :  { %1236 = vmatprep.subr.bf16.mxu1 %v1361_v18 }
  0x3b   :  { %1209 = vmatpush3.bf16.msra.mxu0 %v1360_v17 }
  0x3c   :  { %1210 = vmatprep.subr.bf16.mxu0 %v1363_v20 }
  0x3d   :  { %1237 = vmatpush3.bf16.msra.mxu1 %v1362_v19 }
  0x3e   :  { %1238 = vmatprep.subr.bf16.mxu1 %v1365_v22 }
  0x3f   :  { %1211 = vmatpush3.bf16.msra.mxu0 %v1364_v21 }
  0x40   :  { %1268 = vmatprep.subr.bf16.mxu0 %v1367_v30 }
  0x41   :  { %1239 = vmatpush3.bf16.msra.mxu1 %v1366_v26 }
  0x42   :  { %790 = vmatmul.mubr.bf16.vlgmr.msra.gmra.mxu0 %v62_v29 }
  0x43   :  { %1269 = vmatpush3.bf16.msra.mxu0 %v1367_v30  ;;  %797 = vmatprep.mubr.bf16.mxu0 %v72_v41 }
  0x44   :  { %1270 = vmatprep.subr.bf16.mxu0 %v1368_v37  ;;  %839 = vmatmul.mubr.bf16.vlgmr.msra.gmra.mxu1 %v64_v36 }
  0x45   :  { %846 = vmatprep.mubr.bf16.mxu1 %v74_v47 }
  0x47   :  { %1271 = vmatpush3.bf16.msra.mxu0 %v1368_v37 }
  0x48   :  { %1272 = vmatprep.subr.bf16.mxu0 %v1369_v43 }
  0x4a   :  { %798 = vmatmul.mubr.bf16.gmra.mxu0 %v71_v46 }
  0x4b   :  { %1273 = vmatpush3.bf16.msra.mxu0 %v1369_v43  ;;  %1284 = vmatprep.mubr.bf16.mxu0 %v66_v55 }
  0x4c   :  { %1274 = vmatprep.subr.bf16.mxu0 %v1370_v50  ;;  %847 = vmatmul.mubr.bf16.gmra.mxu1 %v73_v51 }
  0x4f   :  { %1275 = vmatpush3.bf16.msra.mxu0 %v1370_v50 }
  0x50   :  { %10 = vsyncpa [#allocation3], 0  ;;  %1276 = vmatprep.subr.bf16.mxu0 %v1371_v53  ;;  %v1372_v56 = vld [vmem:[%s1780_s1 + $0x210] sm:$0xff]   ;;  %v1373_v57 = vld [vmem:[%s1780_s1 + $0x208] sm:$0xff]   ;;  %vm949_vm0 = vcmask 523264   ;;  %s1401_s17 = smov [#allocation2]  }
  0x51   :  { %v1374_v58 = vld [vmem:[%s1780_s1 + $0x200] sm:$0xff]   ;;  %v48_v59 = vld [vmem:[%s1779_s0 + $0xd0] sm:$0xff]  ;;  %v57_v60 = vld [vmem:[%s1779_s0 + $0x118] sm:$0xff]  ;;  %s1030_s18 = sshll.u32 %s1401_s17, 4  ;;  %s1031_s18 = int_to_ptr.vmem [resolvable:$true] %s1030_s18 }
  0x52   :  { %v75_v61 = vpack.c.bf16 %v57_v60, %v48_v59  ;;  %v1375_v62 = vld [vmem:[%s1782_s3 + $0x18] sm:$0xff]   ;;  %v1376_v63 = vld [vmem:[%s1782_s3 + $0x10] sm:$0xff]   ;;  %v1377_v0 = vld [vmem:[%s1782_s3 + $0x8] sm:$0xff]   ;;  %s1379_s19 = scalar_lea.vmem %s1031_s18, 256  ;;  %p1384_p1 = scmp.lt.s32.totalorder %s1031_s18, %s1031_s18 }
  0x53   :  { %1277 = vmatpush3.bf16.msra.mxu0 %v1371_v53  ;;  %1288 = vmatprep.subr.bf16.mxu1 %v1375_v62  ;;  %v1378_v1 = vld [vmem:[%s1782_s3] sm:$0xff]   ;;  %p1380_p0 = scmp.ne.s32.totalorder %s1031_s18, %s1379_s19  ;;  %p1385_p2 = scmp.lt.s32.totalorder %s1379_s19, %s1379_s19 }
  0x54   :  { %1278 = vmatprep.subr.bf16.mxu0 %v1372_v56  ;;  %1289 = vmatpush3.bf16.msra.mxu1 %v1375_v62  ;;  %v1041_v33 = vld [vmem:[%s1781_s2] ss:$0 sm:$0xff] }
  0x55   :  { %1290 = vmatprep.subr.bf16.mxu1 %v1376_v63  ;;  %p1386_p3 = por %p1385_p2, %p1384_p1 }
  0x57   :  { %1279 = vmatpush3.bf16.msra.mxu0 %v1372_v56  ;;  %p1387_p4 = pnand %p1386_p3, %p1380_p0 }
  0x58   :  { %1280 = vmatprep.subr.bf16.mxu0 %v1373_v57  ;;  %1291 = vmatpush3.bf16.msra.mxu1 %v1376_v63 }
  0x59   :  { %1292 = vmatprep.subr.bf16.mxu1 %v1377_v0 }
  0x5b   :  { %1281 = vmatpush3.bf16.msra.mxu0 %v1373_v57 }
  0x5c   :  { %1282 = vmatprep.subr.bf16.mxu0 %v1374_v58  ;;  %1293 = vmatpush3.bf16.msra.mxu1 %v1377_v0 }
  0x5d   :  { %1294 = vmatprep.subr.bf16.mxu1 %v1378_v1 }
  0x5f   :  { %1283 = vmatpush3.bf16.msra.mxu0 %v1374_v58 }
  0x60   :  { %1295 = vmatpush3.bf16.msra.mxu1 %v1378_v1 }
  0x62   :  { %1285 = vmatmul.mubr.bf16.vlgmr.msra.gmra.mxu0 %v75_v61 }
  0xe2   :  { %v1156_v2 = vpop.f32.mrf.mxu0 }
  0xe4   :  { %v1184_v3 = vpop.f32.mrf.mxu1  ;;  %v1157_v4 = vpop.f32.mrf.mxu0 }
  0xe5   :  { %v1158_v31 = vadd.f32 %v1157_v4, %v1156_v2 }
  0xe6   :  { %v1185_v5 = vpop.f32.mrf.mxu1  ;;  %v1159_v6 = vpop.f32.mrf.mxu0 }
  0xe7   :  { %v694_v38 = vadd.f32 %v1158_v31, %v1041_v33  ;;  %v1186_v39 = vadd.f32 %v1185_v5, %v1184_v3 }
  0xe8   :  { %v1187_v7 = vpop.f32.mrf.mxu1  ;;  %v1160_v8 = vpop.f32.mrf.mxu0 }
  0xe9   :  { %v1161_v34 = vadd.f32 %v1160_v8, %v1159_v6  ;;  %v743_v50 = vadd.f32 %v1186_v39, %v694_v38 }
  0xea   :  { %v1162_v9 = vpop.f32.mrf.mxu0  ;;  %v1188_v10 = vpop.f32.mrf.mxu1 }
  0xeb   :  { %v697_v42 = vadd.f32 %v1161_v34, %v1041_v33  ;;  %v1189_v43 = vadd.f32 %v1188_v10, %v1187_v7 }
  0xec   :  { %v1190_v11 = vpop.f32.mrf.mxu1  ;;  %v1163_v12 = vpop.f32.mrf.mxu0 }
  0xed   :  { %v1164_v35 = vadd.f32 %v1163_v12, %v1162_v9  ;;  %v746_v53 = vadd.f32 %v1189_v43, %v697_v42 }
  0xee   :  { %v1191_v13 = vpop.f32.mrf.mxu1  ;;  %v1165_v14 = vpop.f32.mrf.mxu0 }
  0xef   :  { %v702_v44 = vadd.f32 %v1164_v35, %v1041_v33  ;;  %v1192_v45 = vadd.f32 %v1191_v13, %v1190_v11 }
  0xf0   :  { %v1193_v15 = vpop.f32.mrf.mxu1  ;;  %v1166_v16 = vpop.f32.mrf.mxu0 }
  0xf1   :  { %v1167_v32 = vadd.f32 %v1166_v16, %v1165_v14  ;;  %v751_v54 = vadd.f32 %v1192_v45, %v702_v44 }
  0xf2   :  { %v1194_v18 = vpop.f32.mrf.mxu1 }
  0xf3   :  { %v705_v40 = vadd.f32 %v1167_v32, %v1041_v33  ;;  %v1195_v41 = vadd.f32 %v1194_v18, %v1193_v15  ;;  %v1114_v18 = vld [vmem:[%s1783_s4] ss:$0 sm:$0xff] }
  0xf5   :  { %v754_v51 = vadd.f32 %v1195_v41, %v705_v40 }
 0x102   :  { %v1212_v17 = vpop.f32.mrf.mxu0 }
 0x104   :  { %v1213_v19 = vpop.f32.mrf.mxu0  ;;  %v1240_v20 = vpop.f32.mrf.mxu1 }
 0x105   :  { %v1214_v46 = vadd.f32 %v1213_v19, %v1212_v17 }
 0x106   :  { %v1215_v21 = vpop.f32.mrf.mxu0  ;;  %v1241_v22 = vpop.f32.mrf.mxu1 }
 0x107   :  { %v792_v55 = vadd.f32 %v1214_v46, %v743_v50  ;;  %v1242_v56 = vadd.f32 %v1241_v22, %v1240_v20 }
 0x108   :  { %v1216_v23 = vpop.f32.mrf.mxu0  ;;  %v1243_v24 = vpop.f32.mrf.mxu1 }
 0x109   :  { %v1217_v52 = vadd.f32 %v1216_v23, %v1215_v21  ;;  %v841_v1 = vadd.f32 %v1242_v56, %v792_v55 }
 0x10a   :  { %v1218_v25 = vpop.f32.mrf.mxu0  ;;  %v1244_v26 = vpop.f32.mrf.mxu1 }
 0x10b   :  { %v795_v62 = vadd.f32 %v1217_v52, %v746_v53  ;;  %v1245_v63 = vadd.f32 %v1244_v26, %v1243_v24 }
 0x10c   :  { %v1219_v27 = vpop.f32.mrf.mxu0  ;;  %v1246_v28 = vpop.f32.mrf.mxu1 }
 0x10d   :  { %v1220_v48 = vadd.f32 %v1219_v27, %v1218_v25  ;;  %v844_v7 = vadd.f32 %v1245_v63, %v795_v62 }
 0x10e   :  { %v1221_v29 = vpop.f32.mrf.mxu0  ;;  %v1247_v30 = vpop.f32.mrf.mxu1 }
 0x10f   :  { %v800_v59 = vadd.f32 %v1220_v48, %v751_v54  ;;  %v1248_v60 = vadd.f32 %v1247_v30, %v1246_v28 }
 0x110   :  { %v1222_v36 = vpop.f32.mrf.mxu0  ;;  %v1249_v37 = vpop.f32.mrf.mxu1 }
 0x111   :  { %v1223_v47 = vadd.f32 %v1222_v36, %v1221_v29  ;;  %v849_v3 = vadd.f32 %v1248_v60, %v800_v59 }
 0x112   :  { %v1250_v49 = vpop.f32.mrf.mxu1 }
 0x113   :  { %v803_v57 = vadd.f32 %v1223_v47, %v754_v51  ;;  %v1251_v58 = vadd.f32 %v1250_v49, %v1249_v37 }
 0x115   :  { %v852_v2 = vadd.f32 %v1251_v58, %v803_v57 }
 0x122   :  { %v1286_v61 = vpop.f32.mrf.mxu0 }
 0x123   :  { %v898_v8 = vadd.f32 %v1286_v61, %v849_v3 }
 0x124   :  { %v889_v0 = vpop.f32.mrf.mxu0 }
 0x125   :  { %v890_v5 = vadd.f32 %v889_v0, %v841_v1  ;;  %v906_v14 = vmax.f32 %v898_v8, 0.0 }
 0x126   :  { %v1287_v4 = vpop.f32.mrf.mxu0 }
 0x127   :  { %v901_v6 = vadd.f32 %v1287_v4, %v852_v2  ;;  %v904_v12 = vmax.f32 %v890_v5, 0.0 }
 0x128   :  { %v892_v9 = vpop.f32.mrf.mxu0 }
 0x129   :  { %v893_v10 = vadd.f32 %v892_v9, %v844_v7  ;;  %v907_v11 = vmax.f32 %v901_v6, 0.0 }
 0x12b   :  { %v905_v13 = vmax.f32 %v893_v10, 0.0  ;;  %v909_v16 = vpack.c.bf16 %v907_v11, %v906_v14 }
 0x12d   :  { %v908_v15 = vpack.c.bf16 %v905_v13, %v904_v12 }
 0x12f   :  { %1296 = vmatprep.mubr.msk.bf16.mxu1 %vm949_vm0, %v908_v15 }
 0x130   :  { %1297 = vmatmul.mubr.msk.bf16.vlgmr.msra.gmra.mxu1 %vm949_vm0, %v909_v16 }
 0x1f0   :  { %v1298_v17 = vpop.f32.mrf.mxu1 }
 0x1f1   :  { %v999_v21 = vadd.f32 %v1298_v17, %v1114_v18 }
 0x1f2   :  { %v990_v19 = vpop.f32.mrf.mxu1 }
 0x1f3   :  { %v991_v24 = vadd.f32 %v1114_v18, %v990_v19 }
 0x1f4   :  { %v1299_v20 = vpop.f32.mrf.mxu1 }
 0x1f5   :  { %v1002_v22 = vadd.f32 %v1299_v20, %v1114_v18 }
 0x1f6   :  { %v993_v23 = vpop.f32.mrf.mxu1 }
 0x1f7   :  { %v1137_v25 = vpack.c.bf16 %v1002_v22, %v999_v21  ;;  %v994_v26 = vadd.f32 %v1114_v18, %v993_v23 }
 0x1f9   :  { %1139 = vst [vmem:[#allocation2 + $0x8] sm:$0xff] %v1137_v25   ;;  %v1132_v27 = vpack.c.bf16 %v994_v26, %v991_v24 }
 0x1fb   :  { %1133 = vst [vmem:[#allocation2] sm:$0xff] %v1132_v27  }
 0x1fc   :  { %1390 = shalt.err (!%p1387_p4)
}
 0x1fd   :  { %s1402_s4 = smov 64   ;;  %s1403_s20 = smov 4  }
 0x1fe   :  { %1036 = dma.vmem_to_hbm [thread:$0]  %s1031_s18, 256, %s1784_s5, [#allocation3], %s1402_s4, %s1402_s4, %s1403_s20  }
 0x1ff   :  { %1399 = dma.done.wait [#allocation3], 256  }
 0x200   :  { %1400 = vsyncadd [#allocation3], 4294967040 }
 0x201   :  { %1040 = vsyncpa [#allocation3], 1 }

</bundles_post_ra>
